<compile_context>
chip_gen: v5e
topology: v5e:2x2
jax: 0.10.0
libtpu: 0.0.40
codegen_flags: <defaults>
</compile_context>

<pallas_src>
import math
from functools import partial

import jax
import jax.numpy as jnp
from jax.experimental import pallas as pl
from jax.experimental.pallas import tpu as pltpu


def _defaults_for_device():
    """Per-TPU-generation tile / dtype defaults (see header comments)."""
    kind = jax.devices()[0].device_kind.lower()
    if "v7" in kind:
        # 64 MiB VMEM/TC (32 MiB scoped default) -> raise the scoped limit a bit.
        return dict(compute_dtype=jnp.bfloat16, q_tile=128, k_tile=128,
                    d_chunk=128, vmem_limit_bytes=40 * 1024 * 1024)
    if "v6" in kind:
        # 2x256 MXU + 128 MiB VMEM: wider key tiles double MXU utilization for p@V.
        return dict(compute_dtype=jnp.bfloat16, q_tile=128, k_tile=256,
                    d_chunk=128, vmem_limit_bytes=None)
    if "v5p" in kind:
        return dict(compute_dtype=jnp.bfloat16, q_tile=128, k_tile=128,
                    d_chunk=128, vmem_limit_bytes=None)
    # v5e / older: no bf16 VPU/EUP -> f32 compute; shrink the key tile so the f32
    # (tq, tk, d_chunk) tanh chunk fits the 16 MiB scoped-VMEM default.
    return dict(compute_dtype=jnp.float32, q_tile=128, k_tile=64,
                d_chunk=128, vmem_limit_bytes=None)


def _compiler_params(semantics, vmem_limit_bytes):
    kwargs = {"dimension_semantics": semantics}
    if vmem_limit_bytes is not None:
        kwargs["vmem_limit_bytes"] = int(vmem_limit_bytes)
    return pltpu.CompilerParams(**kwargs)


def _flash_additive_kernel(q_ref, k_ref, v_ref, ws_ref, wo_ref, bo_ref,
                           out_ref, *rest, d_chunk, with_scores):
    """One grid step == (batch b, query tile i, key tile j); j is innermost.

    q_ref: (tq, D) compute_dtype (already projected)
    k_ref/v_ref: (tk, D) compute_dtype (already projected)
    ws_ref: (1, D) compute_dtype score-projection row
    wo_ref: (D, D) compute_dtype; bo_ref: (1, D) f32
    out_ref: (tq, D) f32; [scores_ref: (tq, tk) attn_dtype; lse_ref: (tq, 1) f32]
    scratch: m/l (tq, 1) f32; acc (tq, D) f32
    """
    if with_scores:
        scores_ref, lse_ref, m_scr, l_scr, acc_scr = rest
    else:
        scores_ref = lse_ref = None
        m_scr, l_scr, acc_scr = rest

    j = pl.program_id(2)
    nk = pl.num_programs(2)
    cdt = q_ref.dtype
    D = q_ref.shape[-1]

    # ---- init (first key tile of this query row): zero the online-softmax state ----
    @pl.when(j == 0)
    def _init():
        m_scr[...] = jnp.full(m_scr.shape, -jnp.inf, m_scr.dtype)
        l_scr[...] = jnp.zeros(l_scr.shape, l_scr.dtype)
        acc_scr[...] = jnp.zeros(acc_scr.shape, acc_scr.dtype)

    Q = q_ref[...]                      # (tq, D) compute_dtype (resident across j)
    K = k_ref[...]                      # (tk, D) compute_dtype
    ws = ws_ref[...]                    # (1, D)  compute_dtype
    tq, tk = Q.shape[0], K.shape[0]

    # ---- additive scores, chunked over D so only one (tq, tk, d_chunk) tanh tile
    #      is live. The ws-multiply stays in compute_dtype (no full f32 copy); the
    #      lane-axis reduce accumulates in f32 on the XLU (VPU stays free, EUP tanh
    #      is the bottleneck). Score bias dropped: softmax is shift-invariant.
    #      NOTE: for very large D (D/d_chunk > ~4) switch this unrolled loop to a
    #      lax.fori_loop over ref slices to bound live ranges. ----
    scores = jnp.zeros((tq, tk), jnp.float32)
    for c0 in range(0, D, d_chunk):
        c1 = c0 + d_chunk
        t = jnp.tanh(Q[:, c0:c1][:, None, :] + K[:, c0:c1][None, :, :])  # (tq,tk,dc)
        scores = scores + jnp.sum(t * ws[:, c0:c1][None, :, :], axis=-1,
                                  dtype=jnp.float32)

    # ---- online softmax update (flash-style) ----
    m_prev = m_scr[...]
    m_new = jnp.maximum(m_prev, jnp.max(scores, axis=-1, keepdims=True))
    alpha = jnp.exp(m_prev - m_new)                        # (tq, 1)
    p = jnp.exp(scores - m_new)                            # (tq, tk) f32
    l_scr[...] = alpha * l_scr[...] + jnp.sum(p, axis=-1, keepdims=True)
    acc_scr[...] = alpha * acc_scr[...] + jnp.dot(p.astype(cdt), v_ref[...],
                                                  preferred_element_type=jnp.float32)
    m_scr[...] = m_new

    if with_scores:
        # raw (unnormalized) scores; normalized in place by the 2nd kernel
        scores_ref[...] = scores.astype(scores_ref.dtype)

    # ---- finalize (last key tile): output projection + per-row logsumexp ----
    @pl.when(j == nk - 1)
    def _finalize():
        inv_l = pl.reciprocal(l_scr[...], approx=True)     # EUP reciprocal
        attended = (acc_scr[...] * inv_l).astype(cdt)      # (tq, D)
        out = jnp.dot(attended, wo_ref[...],
                      preferred_element_type=jnp.float32) + bo_ref[...]
        out_ref[...] = out.astype(out_ref.dtype)
        if with_scores:
            lse_ref[...] = m_scr[...] + jnp.log(l_scr[...])


def _softmax_normalize_kernel(scores_ref, lse_ref, attn_ref):
    """attn[i, :] = exp(scores[i, :] - logsumexp_i) -- elementwise; writes in place."""
    s = scores_ref[...].astype(jnp.float32)
    attn_ref[...] = jnp.exp(s - lse_ref[...]).astype(attn_ref.dtype)


def multihead_additive_attention(query, key, value, params, *, num_heads=1,
                                 q_tile=None, k_tile=None, d_chunk=None,
                                 compute_dtype=None, attn_dtype=jnp.bfloat16,
                                 return_attention=True, vmem_limit_bytes=None):
    """Pallas forward. Returns (output (B,S,D) f32, attention_weights (B,H,S,S)).

    Tiles / compute_dtype default per TPU generation (see _defaults_for_device).
    attn_dtype: dtype of the scores/attention HBM streams (bf16 halves traffic).
    return_attention=False skips the scores/lse outputs and the normalize kernel.
    """
    assert num_heads == 1, "reference module only type-checks for num_heads == 1"
    B, S, D = query.shape
    wq, bq, wk, bk, wv, bv, ws, bs, wo, bo = params
    del bs  # softmax is shift-invariant -> the scalar score bias cancels exactly

    dflt = _defaults_for_device()
    cdt = compute_dtype if compute_dtype is not None else dflt["compute_dtype"]
    q_tile = q_tile if q_tile is not None else dflt["q_tile"]
    k_tile = k_tile if k_tile is not None else dflt["k_tile"]
    d_chunk = d_chunk if d_chunk is not None else dflt["d_chunk"]
    if vmem_limit_bytes is None:
        vmem_limit_bytes = dflt["vmem_limit_bytes"]

    tq = min(q_tile, S)
    tk = min(k_tile, S)
    assert S % tq == 0 and S % tk == 0, "seq_len must be divisible by the tiles"
    nq, nk = S // tq, S // tk
    dc = min(d_chunk, D)
    assert D % dc == 0, "d_chunk must divide d_model"
    assert dc == D or dc % 128 == 0, \
        "d_chunk must be lane-dense (multiple of 128) or equal to d_model"

    # ---- hoisted projections: once per token (XLA), stored in compute_dtype ----
    Qp = (query @ wq + bq).astype(cdt)
    Kp = (key @ wk + bk).astype(cdt)
    Vp = (value @ wv + bv).astype(cdt)
    ws_c = ws.astype(cdt)
    wo_c = wo.astype(cdt)

    q_map = lambda b, i, j: (b, i, 0)
    kv_map = lambda b, i, j: (b, j, 0)
    const_map = lambda b, i, j: (0, 0)

    in_specs = [
        pl.BlockSpec((None, tq, D), q_map),     # Qp
        pl.BlockSpec((None, tk, D), kv_map),    # Kp
        pl.BlockSpec((None, tk, D), kv_map),    # Vp
        pl.BlockSpec((1, D), const_map),        # ws
        pl.BlockSpec((D, D), const_map),        # wo
        pl.BlockSpec((1, D), const_map),        # bo
    ]
    out_specs = [pl.BlockSpec((None, tq, D), q_map)]
    out_shapes = [jax.ShapeDtypeStruct((B, S, D), jnp.float32)]
    if return_attention:
        out_specs += [pl.BlockSpec((None, tq, tk), lambda b, i, j: (b, i, j)),
                      pl.BlockSpec((None, tq, 1), q_map)]   # TODO: lane-width-1 store
        out_shapes += [jax.ShapeDtypeStruct((B, S, S), attn_dtype),
                       jax.ShapeDtypeStruct((B, S, 1), jnp.float32)]

    results = pl.pallas_call(
        partial(_flash_additive_kernel, d_chunk=dc, with_scores=return_attention),
        grid=(B, nq, nk),
        in_specs=in_specs,
        out_specs=out_specs,
        out_shape=out_shapes,
        scratch_shapes=[
            pltpu.VMEM((tq, 1), jnp.float32),   # running max
            pltpu.VMEM((tq, 1), jnp.float32),   # running sum
            pltpu.VMEM((tq, D), jnp.float32),   # weighted-V accumulator
        ],
        compiler_params=_compiler_params(("parallel", "parallel", "arbitrary"),
                                         vmem_limit_bytes),
    )(Qp, Kp, Vp, ws_c, wo_c, bo)

    if not return_attention:
        (out,) = results
        return out, None

    out, scores_raw, lse = results

    # Normalize raw scores into attention weights, tiled over both seq axes and
    # written in place over the scores_raw buffer (input_output_aliases).
    attn = pl.pallas_call(
        _softmax_normalize_kernel,
        grid=(B, nq, nk),
        in_specs=[pl.BlockSpec((None, tq, tk), lambda b, i, j: (b, i, j)),
                  pl.BlockSpec((None, tq, 1), lambda b, i, j: (b, i, 0))],
        out_specs=pl.BlockSpec((None, tq, tk), lambda b, i, j: (b, i, j)),
        out_shape=jax.ShapeDtypeStruct((B, S, S), attn_dtype),
        input_output_aliases={0: 0},
        compiler_params=_compiler_params(("parallel", "parallel", "arbitrary"),
                                         vmem_limit_bytes),
    )(scores_raw, lse)

    return out, attn.reshape(B, num_heads, S, S)


def init_params(key, d_model, num_heads):
    """Deterministic PyTorch-Linear-style init (uniform +-1/sqrt(fan_in))."""
    ks = jax.random.split(key, 10)

    def lin(kw, kb, fan_in, fan_out):
        bound = 1.0 / math.sqrt(fan_in)
        w = jax.random.uniform(kw, (fan_in, fan_out), jnp.float32, -bound, bound)
        b = jax.random.uniform(kb, (1, fan_out), jnp.float32, -bound, bound)
        return w, b

    wq, bq = lin(ks[0], ks[1], d_model, d_model)
    wk, bk = lin(ks[2], ks[3], d_model, d_model)
    wv, bv = lin(ks[4], ks[5], d_model, d_model)
    ws_w, ws_b = lin(ks[6], ks[7], d_model, num_heads)   # num_heads == 1
    wo, bo = lin(ks[8], ks[9], d_model, d_model)
    ws = ws_w.T            # (1, d_model) score projection row vector
    bs = ws_b.reshape(1, 1)
    return (wq, bq, wk, bk, wv, bv, ws, bs, wo, bo)


def reference(query, key, value, params):
    """Pure-JAX mirror of the PyTorch forward (num_heads == 1)."""
    wq, bq, wk, bk, wv, bv, ws, bs, wo, bo = params
    Q = query @ wq + bq
    K = key @ wk + bk
    V = value @ wv + bv
    T = jnp.tanh(Q[:, :, None, :] + K[:, None, :, :])          # (B, Sq, Sk, D)
    scores = jnp.einsum('bijd,d->bij', T, ws[0]) + bs[0, 0]
    attn = jax.nn.softmax(scores, axis=-1)
    attended = jnp.einsum('bij,bjd->bid', attn, V)
    out = attended @ wo + bo
    return out, attn[:, None, :, :]


if __name__ == "__main__":
    B, S, d_model, num_heads = 2, 8, 32, 1   # reference is only well-defined for H=1
    root = jax.random.PRNGKey(0)
    k_p, k_q, k_k, k_v = jax.random.split(root, 4)

    params = init_params(k_p, d_model, num_heads)
    query = jax.random.normal(k_q, (B, S, d_model), jnp.float32)
    key = jax.random.normal(k_k, (B, S, d_model), jnp.float32)
    value = jax.random.normal(k_v, (B, S, d_model), jnp.float32)

    fwd = jax.jit(partial(multihead_additive_attention, num_heads=num_heads))
    out, attn = fwd(query, key, value, params)
    jax.block_until_ready((out, attn))

    out_ref, attn_ref = reference(query, key, value, params)
    assert out.shape == (B, S, d_model) and attn.shape == (B, num_heads, S, S)
    assert jnp.allclose(out, out_ref, rtol=2e-2, atol=2e-2)
    assert jnp.allclose(attn.astype(jnp.float32), attn_ref, rtol=2e-2, atol=2e-2)

    print("KERNEL_OK")
</pallas_src>

<mosaic_0001>
module attributes {stable_mosaic.version = 11 : i64} {
  func.func @_softmax_normalize_kernel(%arg0: i32, %arg1: i32, %arg2: i32, %arg3: memref<1x8x8xbf16, #tpu.memory_space<vmem>>, %arg4: memref<1x8x1xf32, #tpu.memory_space<vmem>>, %arg5: memref<1x8x8xbf16, #tpu.memory_space<vmem>>) attributes {dimension_semantics = [#tpu.dimension_semantics<parallel>, #tpu.dimension_semantics<parallel>, #tpu.dimension_semantics<arbitrary>], iteration_bounds = array<i64: 2, 1, 1>, scalar_prefetch = 0 : i64, scratch_operands = 0 : i64, tpu.core_type = #tpu.core_type<tc>, window_params = [{transform_indices = @transform_0, window_bounds = array<i64: 1, 8, 8>}, {transform_indices = @transform_1, window_bounds = array<i64: 1, 8, 1>}, {transform_indices = @transform_2, window_bounds = array<i64: 1, 8, 8>}]} {
    %c0 = arith.constant 0 : index
    %c0_0 = arith.constant 0 : index
    %c0_1 = arith.constant 0 : index
    %0 = vector.load %arg3[%c0, %c0_0, %c0_1] : memref<1x8x8xbf16, #tpu.memory_space<vmem>>, vector<1x8x8xbf16>
    %1 = vector.shape_cast %0 : vector<1x8x8xbf16> to vector<8x8xbf16>
    %2 = arith.extf %1 : vector<8x8xbf16> to vector<8x8xf32>
    %c0_2 = arith.constant 0 : index
    %c0_3 = arith.constant 0 : index
    %c0_4 = arith.constant 0 : index
    %3 = vector.load %arg4[%c0_2, %c0_3, %c0_4] : memref<1x8x1xf32, #tpu.memory_space<vmem>>, vector<1x8x1xf32>
    %4 = vector.shape_cast %3 : vector<1x8x1xf32> to vector<8x1xf32>
    %5 = vector.broadcast %4 : vector<8x1xf32> to vector<8x8xf32>
    %6 = arith.subf %2, %5 : vector<8x8xf32>
    %7 = math.exp %6 : vector<8x8xf32>
    %8 = arith.truncf %7 : vector<8x8xf32> to vector<8x8xbf16>
    %c0_5 = arith.constant 0 : index
    %c0_6 = arith.constant 0 : index
    %c0_7 = arith.constant 0 : index
    %9 = vector.load %arg5[%c0_5, %c0_6, %c0_7] : memref<1x8x8xbf16, #tpu.memory_space<vmem>>, vector<1x8x8xbf16>
    %10 = vector.shape_cast %9 : vector<1x8x8xbf16> to vector<8x8xbf16>
    %11 = vector.shape_cast %8 : vector<8x8xbf16> to vector<1x8x8xbf16>
    tpu.vector_store %arg5[%c0_5, %c0_6, %c0_7], %11 {strides = array<i32>} : memref<1x8x8xbf16, #tpu.memory_space<vmem>>, vector<1x8x8xbf16>,
    return
  }
  func.func @transform_0(%arg0: i32, %arg1: i32, %arg2: i32) -> (i32, i32, i32) {
    %c0_i32 = arith.constant 0 : i32
    return %arg0, %arg1, %arg2 : i32, i32, i32
  }
  func.func @transform_1(%arg0: i32, %arg1: i32, %arg2: i32) -> (i32, i32, i32) {
    %c0_i32 = arith.constant 0 : i32
    %c0_i32_0 = arith.constant 0 : i32
    return %arg0, %arg1, %c0_i32 : i32, i32, i32
  }
  func.func @transform_2(%arg0: i32, %arg1: i32, %arg2: i32) -> (i32, i32, i32) {
    %c0_i32 = arith.constant 0 : i32
    return %arg0, %arg1, %arg2 : i32, i32, i32
  }
}

module attributes {stable_mosaic.version = 11 : i64} {
  func.func @_flash_additive_kernel(%arg0: i32, %arg1: i32, %arg2: i32, %arg3: memref<1x8x32xf32, #tpu.memory_space<vmem>>, %arg4: memref<1x8x32xf32, #tpu.memory_space<vmem>>, %arg5: memref<1x8x32xf32, #tpu.memory_space<vmem>>, %arg6: memref<1x32xf32, #tpu.memory_space<vmem>>, %arg7: memref<32x32xf32, #tpu.memory_space<vmem>>, %arg8: memref<1x32xf32, #tpu.memory_space<vmem>>, %arg9: memref<1x8x32xf32, #tpu.memory_space<vmem>>, %arg10: memref<1x8x8xbf16, #tpu.memory_space<vmem>>, %arg11: memref<1x8x1xf32, #tpu.memory_space<vmem>>, %arg12: memref<8x1xf32, #tpu.memory_space<vmem>>, %arg13: memref<8x1xf32, #tpu.memory_space<vmem>>, %arg14: memref<8x32xf32, #tpu.memory_space<vmem>>) attributes {dimension_semantics = [#tpu.dimension_semantics<parallel>, #tpu.dimension_semantics<parallel>, #tpu.dimension_semantics<arbitrary>], iteration_bounds = array<i64: 2, 1, 1>, scalar_prefetch = 0 : i64, scratch_operands = 3 : i64, tpu.core_type = #tpu.core_type<tc>, window_params = [{transform_indices = @transform_0, window_bounds = array<i64: 1, 8, 32>}, {transform_indices = @transform_1, window_bounds = array<i64: 1, 8, 32>}, {transform_indices = @transform_2, window_bounds = array<i64: 1, 8, 32>}, {pipeline_mode = #tpu.pipeline_mode<synchronous>, transform_indices = @transform_3, window_bounds = array<i64: 1, 32>}, {pipeline_mode = #tpu.pipeline_mode<synchronous>, transform_indices = @transform_4, window_bounds = array<i64: 32, 32>}, {pipeline_mode = #tpu.pipeline_mode<synchronous>, transform_indices = @transform_5, window_bounds = array<i64: 1, 32>}, {transform_indices = @transform_6, window_bounds = array<i64: 1, 8, 32>}, {transform_indices = @transform_7, window_bounds = array<i64: 1, 8, 8>}, {transform_indices = @transform_8, window_bounds = array<i64: 1, 8, 1>}]} {
    %c0_i32 = arith.constant 0 : i32
    %0 = arith.cmpi eq, %arg2, %c0_i32 : i32
    %1 = arith.extui %0 : i1 to i32
    %c0_i32_0 = arith.constant 0 : i32
    %2 = arith.cmpi ne, %1, %c0_i32_0 : i32
    scf.if %2 {
      %cst_32 = arith.constant 0xFF800000 : f32
      %51 = vector.broadcast %cst_32 : f32 to vector<8x1xf32>
      %c0_33 = arith.constant 0 : index
      %c0_34 = arith.constant 0 : index
      %52 = vector.load %arg12[%c0_33, %c0_34] : memref<8x1xf32, #tpu.memory_space<vmem>>, vector<8x1xf32>
      tpu.vector_store %arg12[%c0_33, %c0_34], %51 {strides = array<i32>} : memref<8x1xf32, #tpu.memory_space<vmem>>, vector<8x1xf32>,
      %cst_35 = arith.constant 0.000000e+00 : f32
      %53 = vector.broadcast %cst_35 : f32 to vector<8x1xf32>
      %c0_36 = arith.constant 0 : index
      %c0_37 = arith.constant 0 : index
      %54 = vector.load %arg13[%c0_36, %c0_37] : memref<8x1xf32, #tpu.memory_space<vmem>>, vector<8x1xf32>
      tpu.vector_store %arg13[%c0_36, %c0_37], %53 {strides = array<i32>} : memref<8x1xf32, #tpu.memory_space<vmem>>, vector<8x1xf32>,
      %cst_38 = arith.constant 0.000000e+00 : f32
      %55 = vector.broadcast %cst_38 : f32 to vector<8x32xf32>
      %c0_39 = arith.constant 0 : index
      %c0_40 = arith.constant 0 : index
      %56 = vector.load %arg14[%c0_39, %c0_40] : memref<8x32xf32, #tpu.memory_space<vmem>>, vector<8x32xf32>
      tpu.vector_store %arg14[%c0_39, %c0_40], %55 {strides = array<i32>} : memref<8x32xf32, #tpu.memory_space<vmem>>, vector<8x32xf32>,
    } else {
    }
    %c0 = arith.constant 0 : index
    %c0_1 = arith.constant 0 : index
    %c0_2 = arith.constant 0 : index
    %3 = vector.load %arg3[%c0, %c0_1, %c0_2] : memref<1x8x32xf32, #tpu.memory_space<vmem>>, vector<1x8x32xf32>
    %4 = vector.shape_cast %3 : vector<1x8x32xf32> to vector<8x32xf32>
    %c0_3 = arith.constant 0 : index
    %c0_4 = arith.constant 0 : index
    %c0_5 = arith.constant 0 : index
    %5 = vector.load %arg4[%c0_3, %c0_4, %c0_5] : memref<1x8x32xf32, #tpu.memory_space<vmem>>, vector<1x8x32xf32>
    %6 = vector.shape_cast %5 : vector<1x8x32xf32> to vector<8x32xf32>
    %c0_6 = arith.constant 0 : index
    %c0_7 = arith.constant 0 : index
    %7 = vector.load %arg6[%c0_6, %c0_7] : memref<1x32xf32, #tpu.memory_space<vmem>>, vector<1x32xf32>
    %cst = arith.constant 0.000000e+00 : f32
    %8 = vector.broadcast %cst : f32 to vector<8x8xf32>
    %9 = vector.shape_cast %4 : vector<8x32xf32> to vector<8x1x32xf32>
    %10 = vector.shape_cast %6 : vector<8x32xf32> to vector<1x8x32xf32>
    %11 = vector.broadcast %9 : vector<8x1x32xf32> to vector<8x8x32xf32>
    %12 = vector.broadcast %10 : vector<1x8x32xf32> to vector<8x8x32xf32>
    %13 = arith.addf %11, %12 : vector<8x8x32xf32>
    %14 = math.tanh %13 : vector<8x8x32xf32>
    %15 = vector.shape_cast %7 : vector<1x32xf32> to vector<1x1x32xf32>
    %16 = vector.broadcast %15 : vector<1x1x32xf32> to vector<8x8x32xf32>
    %17 = arith.mulf %14, %16 : vector<8x8x32xf32>
    %cst_8 = arith.constant dense<0.000000e+00> : vector<8x8xf32>
    %18 = vector.multi_reduction <add>, %17, %cst_8 [2] : vector<8x8x32xf32> to vector<8x8xf32>
    %19 = arith.addf %8, %18 : vector<8x8xf32>
    %c0_9 = arith.constant 0 : index
    %c0_10 = arith.constant 0 : index
    %20 = vector.load %arg12[%c0_9, %c0_10] : memref<8x1xf32, #tpu.memory_space<vmem>>, vector<8x1xf32>
    %cst_11 = arith.constant dense<0xFF800000> : vector<8xf32>
    %21 = vector.multi_reduction <maximumf>, %19, %cst_11 [1] : vector<8x8xf32> to vector<8xf32>
    %22 = vector.shape_cast %21 : vector<8xf32> to vector<8x1xf32>
    %23 = arith.maximumf %20, %22 : vector<8x1xf32>
    %24 = arith.subf %20, %23 : vector<8x1xf32>
    %25 = math.exp %24 : vector<8x1xf32>
    %26 = vector.broadcast %23 : vector<8x1xf32> to vector<8x8xf32>
    %27 = arith.subf %19, %26 : vector<8x8xf32>
    %28 = math.exp %27 : vector<8x8xf32>
    %c0_12 = arith.constant 0 : index
    %c0_13 = arith.constant 0 : index
    %29 = vector.load %arg13[%c0_12, %c0_13] : memref<8x1xf32, #tpu.memory_space<vmem>>, vector<8x1xf32>
    %30 = arith.mulf %25, %29 : vector<8x1xf32>
    %cst_14 = arith.constant dense<0.000000e+00> : vector<8xf32>
    %31 = vector.multi_reduction <add>, %28, %cst_14 [1] : vector<8x8xf32> to vector<8xf32>
    %32 = vector.shape_cast %31 : vector<8xf32> to vector<8x1xf32>
    %33 = arith.addf %30, %32 : vector<8x1xf32>
    %c0_15 = arith.constant 0 : index
    %c0_16 = arith.constant 0 : index
    %34 = vector.load %arg13[%c0_15, %c0_16] : memref<8x1xf32, #tpu.memory_space<vmem>>, vector<8x1xf32>
    tpu.vector_store %arg13[%c0_15, %c0_16], %33 {strides = array<i32>} : memref<8x1xf32, #tpu.memory_space<vmem>>, vector<8x1xf32>,
    %c0_17 = arith.constant 0 : index
    %c0_18 = arith.constant 0 : index
    %35 = vector.load %arg14[%c0_17, %c0_18] : memref<8x32xf32, #tpu.memory_space<vmem>>, vector<8x32xf32>
    %36 = vector.broadcast %25 : vector<8x1xf32> to vector<8x32xf32>
    %37 = arith.mulf %36, %35 : vector<8x32xf32>
    %c0_19 = arith.constant 0 : index
    %c0_20 = arith.constant 0 : index
    %c0_21 = arith.constant 0 : index
    %38 = vector.load %arg5[%c0_19, %c0_20, %c0_21] : memref<1x8x32xf32, #tpu.memory_space<vmem>>, vector<1x8x32xf32>
    %39 = vector.shape_cast %38 : vector<1x8x32xf32> to vector<8x32xf32>
    %cst_22 = arith.constant dense<0.000000e+00> : vector<8x32xf32>
    %40 = tpu.matmul %28, %39, %cst_22 {dimension_numbers = #tpu.dot_dimension_numbers<[1], [0], [0], [1], [0, 0, 1, 1], [], []>} : vector<8x8xf32>, vector<8x32xf32>, vector<8x32xf32> -> vector<8x32xf32>
    %41 = arith.addf %37, %40 : vector<8x32xf32>
    %c0_23 = arith.constant 0 : index
    %c0_24 = arith.constant 0 : index
    %42 = vector.load %arg14[%c0_23, %c0_24] : memref<8x32xf32, #tpu.memory_space<vmem>>, vector<8x32xf32>
    tpu.vector_store %arg14[%c0_23, %c0_24], %41 {strides = array<i32>} : memref<8x32xf32, #tpu.memory_space<vmem>>, vector<8x32xf32>,
    %c0_25 = arith.constant 0 : index
    %c0_26 = arith.constant 0 : index
    %43 = vector.load %arg12[%c0_25, %c0_26] : memref<8x1xf32, #tpu.memory_space<vmem>>, vector<8x1xf32>
    tpu.vector_store %arg12[%c0_25, %c0_26], %23 {strides = array<i32>} : memref<8x1xf32, #tpu.memory_space<vmem>>, vector<8x1xf32>,
    %44 = arith.truncf %19 : vector<8x8xf32> to vector<8x8xbf16>
    %c0_27 = arith.constant 0 : index
    %c0_28 = arith.constant 0 : index
    %c0_29 = arith.constant 0 : index
    %45 = vector.load %arg10[%c0_27, %c0_28, %c0_29] : memref<1x8x8xbf16, #tpu.memory_space<vmem>>, vector<1x8x8xbf16>
    %46 = vector.shape_cast %45 : vector<1x8x8xbf16> to vector<8x8xbf16>
    %47 = vector.shape_cast %44 : vector<8x8xbf16> to vector<1x8x8xbf16>
    tpu.vector_store %arg10[%c0_27, %c0_28, %c0_29], %47 {strides = array<i32>} : memref<1x8x8xbf16, #tpu.memory_space<vmem>>, vector<1x8x8xbf16>,
    %c0_i32_30 = arith.constant 0 : i32
    %48 = arith.cmpi eq, %arg2, %c0_i32_30 : i32
    %49 = arith.extui %48 : i1 to i32
    %c0_i32_31 = arith.constant 0 : i32
    %50 = arith.cmpi ne, %49, %c0_i32_31 : i32
    scf.if %50 {
      %c0_32 = arith.constant 0 : index
      %c0_33 = arith.constant 0 : index
      %51 = vector.load %arg13[%c0_32, %c0_33] : memref<8x1xf32, #tpu.memory_space<vmem>>, vector<8x1xf32>
      %52 = tpu.reciprocal %51 {approx = true} : vector<8x1xf32> -> vector<8x1xf32>
      %c0_34 = arith.constant 0 : index
      %c0_35 = arith.constant 0 : index
      %53 = vector.load %arg14[%c0_34, %c0_35] : memref<8x32xf32, #tpu.memory_space<vmem>>, vector<8x32xf32>
      %54 = vector.broadcast %52 : vector<8x1xf32> to vector<8x32xf32>
      %55 = arith.mulf %53, %54 : vector<8x32xf32>
      %c0_36 = arith.constant 0 : index
      %c0_37 = arith.constant 0 : index
      %56 = vector.load %arg7[%c0_36, %c0_37] : memref<32x32xf32, #tpu.memory_space<vmem>>, vector<32x32xf32>
      %cst_38 = arith.constant dense<0.000000e+00> : vector<8x32xf32>
      %57 = tpu.matmul %55, %56, %cst_38 {dimension_numbers = #tpu.dot_dimension_numbers<[1], [0], [0], [1], [0, 0, 1, 1], [], []>} : vector<8x32xf32>, vector<32x32xf32>, vector<8x32xf32> -> vector<8x32xf32>
      %c0_39 = arith.constant 0 : index
      %c0_40 = arith.constant 0 : index
      %58 = vector.load %arg8[%c0_39, %c0_40] : memref<1x32xf32, #tpu.memory_space<vmem>>, vector<1x32xf32>
      %59 = vector.broadcast %58 : vector<1x32xf32> to vector<8x32xf32>
      %60 = arith.addf %57, %59 : vector<8x32xf32>
      %c0_41 = arith.constant 0 : index
      %c0_42 = arith.constant 0 : index
      %c0_43 = arith.constant 0 : index
      %61 = vector.load %arg9[%c0_41, %c0_42, %c0_43] : memref<1x8x32xf32, #tpu.memory_space<vmem>>, vector<1x8x32xf32>
      %62 = vector.shape_cast %61 : vector<1x8x32xf32> to vector<8x32xf32>
      %63 = vector.shape_cast %60 : vector<8x32xf32> to vector<1x8x32xf32>
      tpu.vector_store %arg9[%c0_41, %c0_42, %c0_43], %63 {strides = array<i32>} : memref<1x8x32xf32, #tpu.memory_space<vmem>>, vector<1x8x32xf32>,
      %c0_44 = arith.constant 0 : index
      %c0_45 = arith.constant 0 : index
      %64 = vector.load %arg12[%c0_44, %c0_45] : memref<8x1xf32, #tpu.memory_space<vmem>>, vector<8x1xf32>
      %c0_46 = arith.constant 0 : index
      %c0_47 = arith.constant 0 : index
      %65 = vector.load %arg13[%c0_46, %c0_47] : memref<8x1xf32, #tpu.memory_space<vmem>>, vector<8x1xf32>
      %66 = math.log %65 : vector<8x1xf32>
      %67 = arith.addf %64, %66 : vector<8x1xf32>
      %c0_48 = arith.constant 0 : index
      %c0_49 = arith.constant 0 : index
      %c0_50 = arith.constant 0 : index
      %68 = vector.load %arg11[%c0_48, %c0_49, %c0_50] : memref<1x8x1xf32, #tpu.memory_space<vmem>>, vector<1x8x1xf32>
      %69 = vector.shape_cast %68 : vector<1x8x1xf32> to vector<8x1xf32>
      %70 = vector.shape_cast %67 : vector<8x1xf32> to vector<1x8x1xf32>
      tpu.vector_store %arg11[%c0_48, %c0_49, %c0_50], %70 {strides = array<i32>} : memref<1x8x1xf32, #tpu.memory_space<vmem>>, vector<1x8x1xf32>,
    } else {
    }
    return
  }
  func.func @transform_0(%arg0: i32, %arg1: i32, %arg2: i32) -> (i32, i32, i32) {
    %c0_i32 = arith.constant 0 : i32
    %c0_i32_0 = arith.constant 0 : i32
    return %arg0, %arg1, %c0_i32 : i32, i32, i32
  }
  func.func @transform_1(%arg0: i32, %arg1: i32, %arg2: i32) -> (i32, i32, i32) {
    %c0_i32 = arith.constant 0 : i32
    %c0_i32_0 = arith.constant 0 : i32
    return %arg0, %arg2, %c0_i32 : i32, i32, i32
  }
  func.func @transform_2(%arg0: i32, %arg1: i32, %arg2: i32) -> (i32, i32, i32) {
    %c0_i32 = arith.constant 0 : i32
    %c0_i32_0 = arith.constant 0 : i32
    return %arg0, %arg2, %c0_i32 : i32, i32, i32
  }
  func.func @transform_3(%arg0: i32, %arg1: i32, %arg2: i32) -> (i32, i32) {
    %c0_i32 = arith.constant 0 : i32
    %c0_i32_0 = arith.constant 0 : i32
    %c0_i32_1 = arith.constant 0 : i32
    return %c0_i32, %c0_i32_0 : i32, i32
  }
  func.func @transform_4(%arg0: i32, %arg1: i32, %arg2: i32) -> (i32, i32) {
    %c0_i32 = arith.constant 0 : i32
    %c0_i32_0 = arith.constant 0 : i32
    %c0_i32_1 = arith.constant 0 : i32
    return %c0_i32, %c0_i32_0 : i32, i32
  }
  func.func @transform_5(%arg0: i32, %arg1: i32, %arg2: i32) -> (i32, i32) {
    %c0_i32 = arith.constant 0 : i32
    %c0_i32_0 = arith.constant 0 : i32
    %c0_i32_1 = arith.constant 0 : i32
    return %c0_i32, %c0_i32_0 : i32, i32
  }
  func.func @transform_6(%arg0: i32, %arg1: i32, %arg2: i32) -> (i32, i32, i32) {
    %c0_i32 = arith.constant 0 : i32
    %c0_i32_0 = arith.constant 0 : i32
    return %arg0, %arg1, %c0_i32 : i32, i32, i32
  }
  func.func @transform_7(%arg0: i32, %arg1: i32, %arg2: i32) -> (i32, i32, i32) {
    %c0_i32 = arith.constant 0 : i32
    return %arg0, %arg1, %arg2 : i32, i32, i32
  }
  func.func @transform_8(%arg0: i32, %arg1: i32, %arg2: i32) -> (i32, i32, i32) {
    %c0_i32 = arith.constant 0 : i32
    %c0_i32_0 = arith.constant 0 : i32
    return %arg0, %arg1, %c0_i32 : i32, i32, i32
  }
}

</mosaic_0001>

<bundles_post_ra>
// kernel: multihead_additive_attention.3
= control target key start
LH: loop header
LB: loop body
LE: loop exit
PB: predicated region body
PF: predicated region fallthrough
CT: control target
= control target key end

     0   :  { %s421_s9 = smov 0   ;;  %s423_s10 = smov 0   ;;  %s454_s0 = inlined_call_operand.vmem [shape: bf16[2,8,8], index: 0, kind: input, shape index: {}, may-alias: {0,2}]   ;;  %s455_s1 = inlined_call_operand.vmem [shape: f32[2,8,1], index: 1, kind: input, shape index: {}]   ;;  %s456_s2 = inlined_call_operand.vmem [shape: bf16[2,8,8], index: 2, kind: output, shape index: {}, may-alias: {0,2}]  }
   0x1   :  { %s425_s11 = smov 0  }
   0x2 LB: > { %s31_s12 = sadd.s32 1, %s399_s10  ;;  %p347_p0 = scmp.ge.s32.totalorder %s403_s11, 1  ;;  %s403_s11 = sphi %s425_s11, %s12_s11   ;;  %s399_s10 = sphi %s423_s10, %s458_s10   ;;  %s395_s9 = sphi %s421_s9, %s457_s9  }
   0x3   : > { %p33_p1 = scmp.ge.s32.totalorder %s31_s12, 2  ;;  %p158_p2 = scmp.lt.s32.totalorder %s403_s11, 3 }
   0x5   : > { %s460_s12 = smov (%p33_p1, %s31_s12), 0  ;;  %p159_p3 = pnand %p347_p0, %p158_p2 }
   0x6   : > { %p197_p4 = scmp.lt.s32.totalorder (!%p159_p3), %s395_s9, 1 }
   0x7   : > { %162 = sbr.rel (%p159_p3) target bundleno = 145 (0x91), region = 28 }
   0xc   : > { %v405_v0 = vmov 0   ;;  %s462_s9 = smov (!%p197_p4, %s395_s9), 1  ;;  %vm236_vm0 = vcmask 60416  }
   0xd   : > { %378 = vset.pattern.permute.xlu0 %v405_v0  ;;  %s349_s13 = sshll.u32 %s462_s9, 3  ;;  %s348_s17 = sshll.u32 %s462_s9, 2 }
   0xe   : > { %s213_s16 = scalar_lea.vmem %s455_s1, %s349_s13  ;;  %s206_s20 = scalar_lea.vmem %s454_s0, %s348_s17 }
   0xf   : > { %v226_v1 = vld [vmem:[%s213_s16] sm:$0xff]  ;;  %s223_s23 = scalar_lea.vmem %s456_s2, %s348_s17 }
  0x10   : > { %229 = vperm.xlu0 %378, %v226_v1   ;;  %v224_v2 = vld [vmem:[%s206_s20] sm:$0xf] }
  0x11   : > { %v225_v3 = vunpack.c.l.bf16 %v224_v2 }
  0x82   : > { %v230_v4 = vpop.permute.xlu0 %229 }
  0x83   : > { %v232_v5 = vsub.f32 %v225_v3, %v230_v4 }
  0x85   : > { %v233_v6 = vmul.f32 1.442695, %v232_v5 }
  0x87   : > { %379 = vpow2.f32 %v233_v6 }
  0x8d   : > { %v380_v7 = vpop.eup %379 }
  0x8e   : > { %v235_v8 = vpack.c.bf16 %v380_v7, %v380_v7 }
  0x90   : > { %237 = vst.msk [vmem:[%s223_s23] sm:$0xf] %vm236_vm0, %v235_v8 }
  0x91 PF: > { %s12_s11 = sadd.s32 1, %s403_s11   ;;  %s457_s9 = smov %s399_s10 }
  0x92   : > { %p9_p5 = scmp.ge.s32.totalorder %s12_s11, 4   ;;  %s458_s10 = smov %s460_s12 }
  0x94   :  { %11 = sbr.rel (!%p9_p5) target bundleno = 2 (0x2), region = 61 }

// kernel: multihead_additive_attention.2
= control target key start
LH: loop header
LB: loop body
LE: loop exit
PB: predicated region body
PF: predicated region fallthrough
CT: control target
= control target key end

     0   :  { %s1503_s0 = inlined_call_operand.vmem [shape: f32[2,8,32], index: 0, kind: input, shape index: {}]   ;;  %s1504_s1 = inlined_call_operand.vmem [shape: f32[2,8,32], index: 1, kind: input, shape index: {}]   ;;  %s1505_s2 = inlined_call_operand.vmem [shape: f32[2,8,32], index: 2, kind: input, shape index: {}]   ;;  %s1506_s3 = inlined_call_operand.vmem [shape: f32[1,32], index: 3, kind: input, shape index: {}]   ;;  %s1507_s4 = inlined_call_operand.vmem [shape: f32[32,32], index: 4, kind: input, shape index: {}]   ;;  %s1508_s5 = inlined_call_operand.vmem [shape: f32[1,32], index: 5, kind: input, shape index: {}]   ;;  %s1509_s6 = inlined_call_operand.hbm [shape: f32[2,8,32], index: 6, kind: output, shape index: {0}]   ;;  %s1510_s7 = inlined_call_operand.vmem [shape: bf16[2,8,8], index: 7, kind: output, shape index: {1}]   ;;  %s1511_s8 = inlined_call_operand.vmem [shape: f32[2,8,1], index: 8, kind: output, shape index: {2}]  }
   0x1   :  { %1512 = sst [smem:[#allocation8_spill]] %s1503_s0 }
   0x2   :  { %14 = vsyncpa [#allocation6], 0 }
   0x3   :  { %16 = vsyncpa [#allocation6 + $0x1], 0  ;;  %s1257_s27 = smov 0   ;;  %s1259_s28 = smov 0  }
   0x4   :  { %s1261_s29 = smov 0   ;;  %s1263_s30 = smov 0  }
   0x5   :  { %s1265_s9 = smov 0   ;;  %s1267_s10 = smov 0  }
   0x6 LB: > { %s1011_s11 = sadd.s32 4294967295, %s1207_s10   ;;  %s1012_s12 = sadd.s32 4294967294, %s1207_s10   ;;  %s1207_s10 = sphi %s1267_s10, %s22_s10   ;;  %s1203_s9 = sphi %s1265_s9, %s1520_s9   ;;  %s1199_s30 = sphi %s1263_s30, %s1519_s30   ;;  %s1195_s29 = sphi %s1261_s29, %s1518_s29   ;;  %s1191_s28 = sphi %s1259_s28, %s1517_s28   ;;  %s1187_s27 = sphi %s1257_s27, %s1516_s27  }
   0x7   : > { %s41_s13 = sadd.s32 1, %s1203_s9  ;;  %s197_s14 = sadd.s32 1, %s1195_s29 }
   0x8   : > { %p43_p0 = scmp.ge.s32.totalorder %s41_s13, 2  ;;  %p207_p1 = scmp.ne.s32.totalorder %s1195_s29, %s1191_s28 }
   0x9   : > { %p208_p2 = scmp.eq.s32.totalorder %s1011_s11, 1  ;;  %p213_p3 = scmp.ne.s32.totalorder %s1191_s28, %s1187_s27 }
   0xa   : > { %s1522_s13 = smov (%p43_p0, %s41_s13), 0  ;;  %p214_p5 = scmp.eq.s32.totalorder %s1012_s12, 1 }
   0xb   : > { %p1297_p4 = por %p208_p2, %p207_p1  ;;  %s192_s16 = ssub.s32 %s1203_s9, %s1522_s13 }
   0xc   : > { %p1015_p6 = scmp.ge.s32.totalorder %s1207_s10, 1  ;;  %p195_p7 = scmp.eq.s32.totalorder %s192_s16, 0 }
   0xd   : > { %p1304_p8 = por %p214_p5, %p213_p3  ;;  %p329_p9 = scmp.lt.s32.totalorder %s1207_s10, 3 }
   0xe   : > { %s1310_s18 = scalar_select %p195_p7, %s1195_s29, %s197_s14  }
   0xf   : > { %p330_p10 = pnand %p1015_p6, %p329_p9 }
  0x10   : > { %p396_p11 = scmp.lt.s32.totalorder (!%p330_p10), %s1199_s30, 1  ;;  %s1515_s0 = sld [smem:[#allocation8_spill]] (!%p330_p10) }
  0x11   : > { %333 = sbr.rel (%p330_p10) target bundleno = 922 (0x39a), region = 44  ;;  %s372_s25 = sand.u32 (!%p330_p10), 1, %s1191_s28  }
  0x12   : > { %s1025_s11 = sshll.u32 (!%p330_p10), %s1199_s30, 3 }
  0x16   : > { %s1314_s19 = scalar_select %p396_p11, %s1199_s30, 1  ;;  %v1089_v22 = vld [vmem:[%s1506_s3] ss:$0 sm:$0xff]  ;;  %vm441_vm0 = vcmask 261120   ;;  %vm438_vm1 = vcmask 7168   ;;  %v1209_v50 = vmov -inf   ;;  %v539_v52 = vlaneseq }
  0x17   : > { %439 = vst.msk [vmem:[#allocation2] sm:$0xff] %vm438_vm1, %v1209_v50  ;;  %vm549_vm2 = vcmask 1041409   ;;  %vm551_vm3 = vcmask 1042434   ;;  %vm553_vm4 = vcmask 1043459   ;;  %vm555_vm5 = vcmask 1044484  }
  0x18   : > { %s1317_s20 = sshll.u32 %s1314_s19, 3  ;;  %v1345_v55 = vand.u32 127, %v539_v52  ;;  %vm557_vm6 = vcmask 1045509   ;;  %vm559_vm7 = vcmask 1046534   ;;  %vm561_vm8 = vcmask 1047559   ;;  %s1020_s14 = sshll.u32 %s1314_s19, 2 }
  0x19   : > { %s402_s23 = scalar_lea.vmem %s1515_s0, %s1317_s20  ;;  %s409_s26 = scalar_lea.vmem %s1504_s1, %s1317_s20  ;;  %vm564_vm9 = vcmask 64512   ;;  %vm746_vm10 = vcmask 60416  }
  0x1a   : > { %v443_v0 = vld [vmem:[%s402_s23] sm:$0xff]  ;;  %s426_s22 = scalar_lea.vmem %s1510_s7, %s1020_s14  ;;  %s416_s24 = scalar_lea.vmem %s1505_s2, %s1317_s20 }
  0x1b   : > { %v444_v1 = vld [vmem:[%s409_s26] sm:$0xff]  ;;  %v454_v2 = vperm.slane %v443_v0, 0  ;;  %v448_v3 = vrot.slane %v443_v0, 2  ;;  %v450_v4 = vrot.slane %v443_v0, 4  ;;  %v447_v5 = vrot.slane %v443_v0, 1  ;;  %s433_s19 = scalar_lea.vmem %s1511_s8, %s1317_s20  ;;  %s1016_s26 = sshll.u32 %s372_s25, 3 }
  0x1c   : > { %v449_v6 = vrot.slane %v443_v0, 3  ;;  %v451_v7 = vrot.slane %v443_v0, 5  ;;  %v452_v8 = vrot.slane %v443_v0, 6  ;;  %v453_v15 = vrot.slane %v443_v0, 7  ;;  %s827_s14 = scalar_lea.hbm %s1509_s6, %s1025_s11 }
  0x1d   : > { %v470_v9 = vadd.f32 %v454_v2, %v444_v1  ;;  %v456_v10 = vperm.slane %v448_v3, 0  ;;  %v458_v11 = vperm.slane %v450_v4, 0  ;;  %v455_v12 = vperm.slane %v447_v5, 0  ;;  %s831_s23 = sshll.u32 %s827_s14, 4  ;;  %s832_s23 = int_to_ptr.hbm [resolvable:$true] %s831_s23 }
  0x1e   : > { %v457_v13 = vperm.slane %v449_v6, 0  ;;  %v459_v14 = vperm.slane %v451_v7, 0  ;;  %v460_v21 = vperm.slane %v452_v8, 0  ;;  %v461_v23 = vperm.slane %v453_v15, 0  ;;  %s1143_s30 = sshra.s32 %s832_s23, 4  ;;  %s1144_s30 = int_to_ptr.hbm [resolvable:$true] %s1143_s30 }
  0x1f   : > { %1091 = vtanh.f32 %v470_v9  ;;  %v472_v16 = vadd.f32 %v456_v10, %v444_v1  ;;  %v474_v17 = vadd.f32 %v458_v11, %v444_v1  ;;  %v471_v18 = vadd.f32 %v455_v12, %v444_v1  ;;  %s1145_s0 = scalar_lea.hbm %s1144_s30, 8  ;;  %p1150_p1 = scmp.lt.s32.totalorder %s1144_s30, %s1509_s6 }
  0x20   : > { %v473_v19 = vadd.f32 %v457_v13, %v444_v1  ;;  %v475_v20 = vadd.f32 %v459_v14, %v444_v1  ;;  %v476_v25 = vadd.f32 %v460_v21, %v444_v1  ;;  %v477_v28 = vadd.f32 %v461_v23, %v444_v1  ;;  %p1146_p12 = scmp.ne.s32.totalorder %s1144_s30, %s1145_s0 }
  0x21   : > { %1093 = vtanh.f32 %v472_v16 }
  0x22   : > { %1095 = vtanh.f32 %v474_v17  ;;  %p1147_p13 = pnand %p1146_p12, %p1297_p4 }
  0x23   : > { %1097 = vtanh.f32 %v471_v18 }
  0x24   : > { %1099 = vtanh.f32 %v473_v19  ;;  %p1148_p0 = pneg %p1147_p13 }
  0x25   : > { %v1092_v24 = vpop.eup %1091  ;;  %1101 = vtanh.f32 %v475_v20 }
  0x26   : > { %v489_v26 = vmul.f32 %v1092_v24, %v1089_v22  ;;  %1103 = vtanh.f32 %v476_v25 }
  0x27   : > { %v1094_v27 = vpop.eup %1093  ;;  %1105 = vtanh.f32 %v477_v28 }
  0x28   : > { %v1096_v29 = vpop.eup %1095  ;;  %v498_v30 = vsel %vm441_vm0, %v489_v26, 0.0  ;;  %v491_v31 = vmul.f32 %v1094_v27, %v1089_v22 }
  0x29   : > { %v1098_v32 = vpop.eup %1097  ;;  %499 = vadd.xlane.f32.xlu0 %v498_v30  ;;  %v493_v33 = vmul.f32 %v1096_v29, %v1089_v22 }
  0x2a   : > { %v1100_v34 = vpop.eup %1099  ;;  %v504_v35 = vsel %vm441_vm0, %v491_v31, 0.0  ;;  %v490_v36 = vmul.f32 %v1098_v32, %v1089_v22 }
  0x2b   : > { %v1102_v37 = vpop.eup %1101  ;;  %505 = vadd.xlane.f32.xlu1 %v504_v35  ;;  %v510_v38 = vsel %vm441_vm0, %v493_v33, 0.0  ;;  %v492_v39 = vmul.f32 %v1100_v34, %v1089_v22 }
  0x2c   : > { %511 = vadd.xlane.f32.xlu2 %v510_v38  ;;  %v494_v40 = vmul.f32 %v1102_v37, %v1089_v22  ;;  %v501_v41 = vsel %vm441_vm0, %v490_v36, 0.0  ;;  %v1104_v42 = vpop.eup %1103 }
  0x2d   : > { %v507_v43 = vsel %vm441_vm0, %v492_v39, 0.0  ;;  %v1106_v44 = vpop.eup %1105  ;;  %v495_v46 = vmul.f32 %v1104_v42, %v1089_v22 }
  0x2e   : > { %v513_v45 = vsel %vm441_vm0, %v494_v40, 0.0  ;;  %v496_v47 = vmul.f32 %v1106_v44, %v1089_v22 }
  0x2f   : > { %v516_v48 = vsel %vm441_vm0, %v495_v46, 0.0  ;;  %v1211_v46 = vmov 0.0  }
  0x30   : > { %v519_v49 = vsel %vm441_vm0, %v496_v47, 0.0  ;;  %442 = vst.msk [vmem:[#allocation4] sm:$0xff] %vm441_vm0, %v1211_v46  ;;  %v530_v47 = vld [vmem:[#allocation2] sm:$0xff] }
  0x31   : > { %502 = vadd.xlane.f32.xlu0 %v501_v41  ;;  %440 = vst.msk [vmem:[#allocation3] sm:$0xff] %vm438_vm1, %v1211_v46 }
  0x33   : > { %508 = vadd.xlane.f32.xlu1 %v507_v43 }
  0x34   : > { %514 = vadd.xlane.f32.xlu2 %v513_v45  ;;  %v1210_v45 = vmov 0  }
  0x35   : > { %1086 = vset.pattern.permute.xlu0 %v1210_v45  ;;  %1088 = vset.pattern.permute.xlu2 %v1210_v45 }
  0x36   : > { %1087 = vset.pattern.permute.xlu1 %v1210_v45 }
  0x39   : > { %517 = vadd.xlane.f32.xlu0 %v516_v48 }
  0x3b   : > { %520 = vadd.xlane.f32.xlu1 %v519_v49 }
  0x9c   : > { %v1339_v51 = vpop.xlane.xlu0 %499 }
  0x9d   : > { %v705_v56 = vpack.c.bf16 %v1339_v51, %v1339_v51  ;;  %v541_v60 = vperm.slane %v1339_v51, %v1345_v55 }
  0x9e   : > { %v1341_v53 = vpop.xlane.xlu1 %505 }
  0x9f   : > { %v1343_v54 = vpop.xlane.xlu2 %511  ;;  %v707_v57 = vpack.c.bf16 %v1341_v53, %v1341_v53  ;;  %v721_v61 = vunpack.c.l.b16 %v705_v56  ;;  %v543_v0 = vperm.slane %v1341_v53, %v1345_v55 }
  0xa0   : > { %v709_v58 = vpack.c.bf16 %v1343_v54, %v1343_v54  ;;  %v545_v8 = vperm.slane %v1343_v54, %v1345_v55 }
  0xa1   : > { %v723_v1 = vunpack.c.l.b16 %v707_v57  ;;  %v729_v12 = vperm.slane %v721_v61, %v1345_v55 }
  0xa2   : > { %v725_v9 = vunpack.c.l.b16 %v709_v58 }
  0xa3   : > { %v731_v16 = vperm.slane %v723_v1, %v1345_v55 }
  0xa4   : > { %v1353_v59 = vpop.xlane.xlu0 %502  ;;  %v733_v22 = vperm.slane %v725_v9, %v1345_v55 }
  0xa5   : > { %v542_v62 = vperm.slane %v1353_v59, %v1345_v55  ;;  %v706_v63 = vpack.c.bf16 %v1353_v59, %v1353_v59 }
  0xa6   : > { %v1363_v2 = vpop.xlane.xlu1 %508 }
  0xa7   : > { %v550_v3 = vsel %vm549_vm2, %v542_v62, %v541_v60  ;;  %v722_v4 = vunpack.c.l.b16 %v706_v63  ;;  %v544_v5 = vperm.slane %v1363_v2, %v1345_v55  ;;  %v708_v6 = vpack.c.bf16 %v1363_v2, %v1363_v2  ;;  %v1370_v7 = vpop.xlane.xlu2 %514 }
  0xa8   : > { %v552_v10 = vsel %vm551_vm3, %v543_v0, %v550_v3  ;;  %v710_v11 = vpack.c.bf16 %v1370_v7, %v1370_v7  ;;  %v546_v17 = vperm.slane %v1370_v7, %v1345_v55 }
  0xa9   : > { %v730_v13 = vperm.slane %v722_v4, %v1345_v55  ;;  %v554_v14 = vsel %vm553_vm4, %v544_v5, %v552_v10  ;;  %v724_v15 = vunpack.c.l.b16 %v708_v6 }
  0xaa   : > { %v726_v18 = vunpack.c.l.b16 %v710_v11  ;;  %v556_v21 = vsel %vm555_vm5, %v545_v8, %v554_v14 }
  0xab   : > { %v737_v19 = vsel %vm549_vm2, %v730_v13, %v729_v12  ;;  %v732_v20 = vperm.slane %v724_v15, %v1345_v55  ;;  %v558_v30 = vsel %vm557_vm6, %v546_v17, %v556_v21 }
  0xac   : > { %v738_v23 = vsel %vm551_vm3, %v731_v16, %v737_v19  ;;  %v518_v24 = vpop.xlane.xlu0 %517  ;;  %v734_v28 = vperm.slane %v726_v18, %v1345_v55 }
  0xad   : > { %v739_v25 = vsel %vm553_vm4, %v732_v20, %v738_v23  ;;  %v547_v26 = vperm.slane %v518_v24, %v1345_v55  ;;  %v711_v27 = vpack.c.bf16 %v518_v24, %v518_v24 }
  0xae   : > { %v1391_v29 = vpop.xlane.xlu1 %520  ;;  %v740_v31 = vsel %vm555_vm5, %v733_v22, %v739_v25 }
  0xaf   : > { %v727_v32 = vunpack.c.l.b16 %v711_v27  ;;  %v548_v33 = vperm.slane %v1391_v29, %v1345_v55  ;;  %v712_v34 = vpack.c.bf16 %v1391_v29, %v1391_v29  ;;  %v560_v35 = vsel %vm559_vm7, %v547_v26, %v558_v30 }
  0xb0   : > { %v741_v40 = vsel %vm557_vm6, %v734_v28, %v740_v31 }
  0xb1   : > { %v735_v36 = vperm.slane %v727_v32, %v1345_v55  ;;  %v728_v37 = vunpack.c.l.b16 %v712_v34  ;;  %v562_v38 = vsel %vm561_vm8, %v548_v33, %v560_v35 }
  0xb2   : > { %v565_v39 = vsel %vm564_vm9, %v562_v38, -inf }
  0xb3   : > { %v736_v41 = vperm.slane %v728_v37, %v1345_v55  ;;  %566 = vmax.xlane.f32.xlu2 %v565_v39  ;;  %v742_v42 = vsel %vm559_vm7, %v735_v36, %v741_v40 }
  0xb5   : > { %v743_v43 = vsel %vm561_vm8, %v736_v41, %v742_v42 }
  0xb6   : > { %v744_v44 = vpack.c.b16 %v743_v43, %v743_v43 }
  0xb8   : > { %747 = vst.msk [vmem:[%s426_s22] sm:$0xf] %vm746_vm10, %v744_v44  ;;  %s374_s22 = scalar_lea.vmem [#allocation5], %s1016_s26  ;;  %s1149_s26 = scalar_lea.hbm %s1509_s6, 16 }
  0xb9   : > { %p1151_p2 = scmp.lt.s32.totalorder %s1149_s26, %s1145_s0 }
  0xbb   : > { %p1152_p3 = por %p1151_p2, %p1150_p1 }
  0xbd   : > { %p1153_p5 = pnand %p1152_p3, %p1148_p0 }
 0x126   : > { %v567_v48 = vpop.xlane.xlu2 %566 }
 0x127   : > { %v568_v49 = vmax.f32 %v530_v47, %v567_v48  ;;  %v763_v48 = vld [vmem:[%s1507_s4 + $0x18] sm:$0xff] }
 0x128   : > { %783 = vmatpush.msra.mxu1 %v763_v48 }
 0x129   : > { %v569_v50 = vsub.f32 %v530_v47, %v568_v49  ;;  %704 = vst.msk [vmem:[#allocation2] sm:$0xff] %vm438_vm1, %v568_v49  ;;  %574 = vperm.xlu0 %1086, %v568_v49   ;;  %v762_v49 = vld [vmem:[%s1507_s4 + $0x10] sm:$0xff] }
 0x12a   : > { %784 = vmatpush.msra.mxu1 %v762_v49 }
 0x12b   : > { %v570_v8 = vmul.f32 1.442695, %v569_v50  ;;  %v616_v50 = vld [vmem:[#allocation3] sm:$0xff] }
 0x19b   : > { %v575_v52 = vpop.permute.xlu0 %574 }
 0x19c   : > { %v582_v56 = vperm.slane %v575_v52, 6  ;;  %v577_v57 = vperm.slane %v575_v52, 1  ;;  %v576_v58 = vperm.slane %v575_v52, 0  ;;  %v578_v63 = vperm.slane %v575_v52, 2 }
 0x19d   : > { %v579_v0 = vperm.slane %v575_v52, 3  ;;  %v580_v10 = vperm.slane %v575_v52, 4 }
 0x19e   : > { %v598_v60 = vsub.f32 %v518_v24, %v582_v56  ;;  %v593_v61 = vsub.f32 %v1353_v59, %v577_v57  ;;  %v592_v62 = vsub.f32 %v1339_v51, %v576_v58  ;;  %v594_v5 = vsub.f32 %v1341_v53, %v578_v63  ;;  %v679_v24 = vld [vmem:[%s416_s24] sm:$0xff]  ;;  %v672_v58 = vld [vmem:[#allocation4] sm:$0xff]  ;;  %s799_s24 = scalar_lea.sflag [#allocation6], %s372_s25 }
 0x19f   : > { %v595_v6 = vsub.f32 %v1363_v2, %v579_v0  ;;  %v581_v59 = vperm.slane %v575_v52, 5  ;;  %v596_v14 = vsub.f32 %v1343_v54, %v580_v10  ;;  %v583_v2 = vperm.slane %v575_v52, 7  ;;  %697 = vmatpush.msra.mxu0 %v679_v24 }
 0x1a0   : > { %v612_v1 = vmul.f32 1.442695, %v598_v60  ;;  %v602_v3 = vmul.f32 1.442695, %v593_v61  ;;  %v600_v4 = vmul.f32 1.442695, %v592_v62 }
 0x1a1   : > { %v604_v9 = vmul.f32 1.442695, %v594_v5  ;;  %v606_v12 = vmul.f32 1.442695, %v595_v6  ;;  %v597_v53 = vsub.f32 %v1370_v7, %v581_v59  ;;  %v608_v15 = vmul.f32 1.442695, %v596_v14 }
 0x1a2   : > { %1107 = vpow2.f32 %v612_v1  ;;  %v599_v20 = vsub.f32 %v1391_v29, %v583_v2  ;;  %v792_v5 = vld [vmem:[#allocation2] sm:$0xff] }
 0x1a3   : > { %1109 = vpow2.f32 %v602_v3  ;;  %v610_v17 = vmul.f32 1.442695, %v597_v53 }
 0x1a4   : > { %1111 = vpow2.f32 %v600_v4  ;;  %v614_v21 = vmul.f32 1.442695, %v599_v20 }
 0x1a5   : > { %1113 = vpow2.f32 %v570_v8  ;;  %v760_v8 = vld [vmem:[%s1507_s4] sm:$0xff] }
 0x1a6   : > { %1115 = vpow2.f32 %v604_v9 }
 0x1a7   : > { %1117 = vpow2.f32 %v606_v12  ;;  %v1090_v12 = vld [vmem:[%s1508_s5] ss:$0 sm:$0xff] }
 0x1a8   : > { %v1108_v11 = vpop.eup %1107  ;;  %1119 = vpow2.f32 %v608_v15 }
 0x1a9   : > { %v1110_v13 = vpop.eup %1109  ;;  %645 = vperm.xlu0 %1086, %v1108_v11   ;;  %1121 = vpow2.f32 %v610_v17 }
 0x1aa   : > { %v1112_v51 = vpop.eup %1111  ;;  %630 = vperm.xlu2 %1088, %v1110_v13   ;;  %1123 = vpow2.f32 %v614_v21 }
 0x1ab   : > { %627 = vperm.xlu1 %1087, %v1112_v51   ;;  %v1114_v16 = vpop.eup %1113 }
 0x1ac   : > { %v1116_v18 = vpop.eup %1115  ;;  %v617_v52 = vmul.f32 %v1114_v16, %v616_v50 }
 0x1ad   : > { %v1118_v19 = vpop.eup %1117 }
 0x1ae   : > { %v1120_v22 = vpop.eup %1119 }
 0x1af   : > { %v1122_v54 = vpop.eup %1121 }
 0x1b0   : > { %v1124_v7 = vpop.eup %1123 }
 0x1b1   : > { %675 = vperm.xlu0 %1086, %v1114_v16  }
 0x1b2   : > { %633 = vperm.xlu2 %1088, %v1116_v18  }
 0x1b3   : > { %636 = vperm.xlu1 %1087, %v1118_v19  }
 0x1ba   : > { %639 = vperm.xlu2 %1088, %v1120_v22  }
 0x1bb   : > { %642 = vperm.xlu1 %1087, %v1122_v54  }
 0x1c2   : > { %648 = vperm.xlu2 %1088, %v1124_v7  }
 0x204   : > { %v631_v23 = vpop.permute.xlu2 %630 }
 0x205   : > { %v651_v30 = vperm.slane %v631_v23, %v1345_v55 }
 0x20c   : > { %v634_v25 = vpop.permute.xlu2 %633 }
 0x20d   : > { %v652_v33 = vperm.slane %v634_v25, %v1345_v55 }
 0x214   : > { %v640_v27 = vpop.permute.xlu2 %639 }
 0x215   : > { %v654_v37 = vperm.slane %v640_v27, %v1345_v55 }
 0x21b   : > { %v646_v35 = vpop.permute.xlu0 %645 }
 0x21c   : > { %v649_v38 = vpop.permute.xlu2 %648  ;;  %v656_v41 = vperm.slane %v646_v35, %v1345_v55 }
 0x21d   : > { %v628_v26 = vpop.permute.xlu1 %627  ;;  %v657_v43 = vperm.slane %v649_v38, %v1345_v55 }
 0x21e   : > { %v650_v28 = vperm.slane %v628_v26, %v1345_v55 }
 0x220   : > { %v658_v31 = vsel %vm549_vm2, %v651_v30, %v650_v28 }
 0x221   : > { %v659_v34 = vsel %vm551_vm3, %v652_v33, %v658_v31 }
 0x223   : > { %v676_v60 = vpop.permute.xlu0 %675 }
 0x224   : > { %v678_v61 = vmul.f32 %v676_v60, %v672_v58 }
 0x225   : > { %v637_v29 = vpop.permute.xlu1 %636 }
 0x226   : > { %v653_v32 = vperm.slane %v637_v29, %v1345_v55 }
 0x228   : > { %v660_v36 = vsel %vm553_vm4, %v653_v32, %v659_v34 }
 0x229   : > { %v661_v42 = vsel %vm555_vm5, %v654_v37, %v660_v36 }
 0x22d   : > { %v643_v39 = vpop.permute.xlu1 %642 }
 0x22e   : > { %v655_v40 = vperm.slane %v643_v39, %v1345_v55  ;;  %v761_v55 = vld [vmem:[%s1507_s4 + $0x8] sm:$0xff] }
 0x22f   : > { %785 = vmatpush.msra.mxu1 %v761_v55 }
 0x230   : > { %v662_v44 = vsel %vm557_vm6, %v655_v40, %v661_v42 }
 0x231   : > { %v663_v45 = vsel %vm559_vm7, %v656_v41, %v662_v44  ;;  %786 = vmatpush.msra.mxu1 %v760_v8 }
 0x232   : > { %v664_v46 = vsel %vm561_vm8, %v657_v43, %v663_v45 }
 0x233   : > { %1022 = vmatmul.msk.f32.vlgmr.msra.gmra.mxu0 %vm564_vm9, %v664_v46  ;;  %v666_v47 = vsel %vm564_vm9, %v664_v46, 0.0 }
 0x234   : > { %667 = vadd.xlane.f32.xlu1 %v666_v47 }
 0x2a7   : > { %v668_v56 = vpop.xlane.xlu1 %667 }
 0x2a8   : > { %v669_v57 = vadd.f32 %v668_v56, %v617_v52 }
 0x2aa   : > { %671 = vst.msk [vmem:[#allocation3] sm:$0xff] %vm438_vm1, %v669_v57 }
 0x2b0   : > { %v699_v62 = vpop.f32.mrf.mxu0 }
 0x2b1   : > { %v793_v63 = vld [vmem:[#allocation3] sm:$0xff]  ;;  %v702_v0 = vadd.f32 %v699_v62, %v678_v61 }
 0x2b2   : > { %1125 = vlog2.f32 %v793_v63 }
 0x2b3   : > { %703 = vst.msk [vmem:[#allocation4] sm:$0xff] %vm441_vm0, %v702_v0  ;;  %1127 = vrcp.f32 %v793_v63 }
 0x2b8   : > { %v1126_v1 = vpop.eup %1125 }
 0x2b9   : > { %v1128_v3 = vpop.eup %1127  ;;  %v795_v4 = vmul.f32 0.6931472, %v1126_v1 }
 0x2ba   : > { %756 = vperm.xlu2 %1088, %v1128_v3   ;;  %v753_v9 = vld [vmem:[#allocation4] sm:$0xff] }
 0x2bb   : > { %v796_v6 = vadd.f32 %v795_v4, %v792_v5 }
 0x2bd   : > { %797 = vst.msk [vmem:[%s433_s19] sm:$0xff] %vm438_vm1, %v796_v6  ;;  %s829_s19 = sshll.u32 %s374_s22, 4  ;;  %s830_s19 = int_to_ptr.vmem [resolvable:$true] %s829_s19 }
 0x314   : > { %v757_v10 = vpop.permute.xlu2 %756 }
 0x315   : > { %v759_v11 = vmul.f32 %v757_v10, %v753_v9 }
 0x317   : > { %1023 = vmatmul.msk.f32.vlgmr.msra.gmra.mxu1 %vm441_vm0, %v759_v11 }
 0x394   : > { %v788_v59 = vpop.f32.mrf.mxu1 }
 0x395   : > { %v789_v13 = vadd.f32 %v1090_v12, %v788_v59 }
 0x397   : > { %791 = vst.msk [vmem:[%s374_s22] sm:$0xff] %vm441_vm0, %v789_v13 }
 0x398   : > { %1156 = shalt.err (!%p1153_p5)
}
 0x399   : > { %1028 = dma.vmem_to_hbm [thread:$0]  (%p1297_p4), %s830_s19, 128, %s832_s23, %s799_s24  }
 0x39a PF: > { %p1034_p6 = scmp.ge.s32.totalorder %s1207_s10, 2  ;;  %s849_s25 = sand.u32 1, %s1187_s27  }
 0x39b   : > { %s850_s16 = scalar_lea.sflag [#allocation6], %s849_s25 }
 0x39c   : > { %p1031_p7 = pnand %p1034_p6, %p1304_p8 }
 0x39e   : > { %p1032_p9 = pneg %p1031_p7 }
 0x3a0   : > { %1182 = dma.done.wait (%p1032_p9), %s850_s16, 128  }
 0x3a1   : > { %1184 = vsyncadd (%p1032_p9), %s850_s16, 4294967168  ;;  %s22_s10 = sadd.s32 1, %s1207_s10   ;;  %s1516_s27 = smov %s1191_s28 }
 0x3a2   : > { %p19_p10 = scmp.ge.s32.totalorder %s22_s10, 4   ;;  %s1517_s28 = smov %s1195_s29 }
 0x3a3   : > { %s1518_s29 = smov %s1310_s18  ;;  %s1519_s30 = smov %s1203_s9 }
 0x3a4   : > { %s1520_s9 = smov %s1522_s13  ;;  %21 = sbr.rel (!%p19_p10) target bundleno = 6 (0x6), region = 117 }
 0x3a9   :  { %879 = vsyncpa [#allocation6], 1 }
 0x3aa   :  { %881 = vsyncpa [#allocation6 + $0x1], 1 }

</bundles_post_ra>
